<compile_context>
chip_gen: v7x
topology: tpu7x:2x2x1
jax: 0.10.0
libtpu: 0.0.40
codegen_flags: <defaults>
</compile_context>

<pallas_src>
import functools
from math import pi as PI

import jax
import jax.numpy as jnp
from jax.experimental import pallas as pl
from jax.experimental.pallas import tpu as pltpu

_LANE = 128


def _choose_tile(T, tile=None, max_tile=4096):
    """Lane-tile for the triplet axis.

    Big tiles amortize the ~0.35us per-grid-step overhead; we also keep the
    grid length >= 2 when possible so the "parallel" axis can shard across
    both v7x TensorCores (megacore).
    """
    if tile is not None:
        return tile
    half = -(-T // 2)                       # cdiv(T, 2)
    t = -(-half // _LANE) * _LANE           # round up to a lane multiple
    return max(_LANE, min(max_tile, t))


# ---------------------------------------------------------------------------
# Kernel 1: per-EDGE radial tables (BesselBasisLayer + SBF radial factor).
# ---------------------------------------------------------------------------
def _edge_radial_kernel(d_ref, freq_ref, bessel_ref, sbf_tab_ref, *,
                        num_radial, inv_cutoff, p):
    # d_ref      : (1, te)   raw edge distances (lane axis = edges)
    # freq_ref   : (k, 1)    BesselBasisLayer (trainable) frequencies
    # bessel_ref : (k, te)   env(d) * sin(freq_j * d)
    # sbf_tab_ref: (k, te)   env(d) * sin(j*pi*d) / (j*pi*d)
    a = -(p + 1) * (p + 2) / 2.0
    b = float(p * (p + 2))
    c = -p * (p + 1) / 2.0

    d = d_ref[...] * inv_cutoff                        # (1, te)
    inv_d = 1.0 / d                                    # exact; shared w/ envelope
    d_p0 = d ** (p - 1)                                # shared-multiply powers
    d_p1 = d_p0 * d
    d_p2 = d_p1 * d
    env = (inv_d + a * d_p0 + b * d_p1 + c * d_p2) * (d < 1.0).astype(d.dtype)

    # BesselBasisLayer.forward
    bessel_ref[...] = (env * jnp.sin(freq_ref[...] * d)).astype(bessel_ref.dtype)

    # SphericalBasisLayer radial factor (fixed j*pi frequencies), folded as
    # sin(arg)/arg * env = sin(f*d) * (1/f) * (inv_d * env) -> one divide total.
    j_col = jax.lax.broadcasted_iota(jnp.int32, (num_radial, 1), 0)
    f0 = (j_col.astype(jnp.float32) + 1.0) * PI        # (k, 1)
    sbf_tab_ref[...] = (jnp.sin(f0 * d) * ((1.0 / f0) * (inv_d * env))
                        ).astype(sbf_tab_ref.dtype)


def edge_radial_tables(dist, freq, *, num_radial, cutoff=5.0,
                       envelope_exponent=5, edge_tile=None):
    """Per-edge radial tables.

    Returns:
      bessel:       (E, num_radial)  == BesselBasisLayer.forward(dist)
      radial_table: (num_radial, Ep) env*sinc table; columns >= E are padding.
    """
    E = dist.shape[0]
    k = num_radial
    Er = -(-E // _LANE) * _LANE
    te = edge_tile if edge_tile is not None else min(Er, 1024)
    Ep = -(-Er // te) * te
    d2 = jnp.pad(dist.astype(jnp.float32), (0, Ep - E),
                 constant_values=0.5 * cutoff).reshape(1, Ep)
    freq_col = jnp.asarray(freq, jnp.float32).reshape(k, 1)

    kernel = functools.partial(_edge_radial_kernel, num_radial=k,
                               inv_cutoff=1.0 / float(cutoff),
                               p=envelope_exponent + 1)
    cost = pl.CostEstimate(flops=int(Ep * (4 * k + 16 + 20 * 2 * k)),
                           transcendentals=int(Ep * 2 * k),
                           bytes_accessed=int(Ep * 4 * (2 * k + 1)))
    bessel_t, radial_table = pl.pallas_call(
        kernel,
        out_shape=(jax.ShapeDtypeStruct((k, Ep), jnp.float32),
                   jax.ShapeDtypeStruct((k, Ep), jnp.float32)),
        grid=(Ep // te,),
        in_specs=[pl.BlockSpec((1, te), lambda i: (0, i)),
                  pl.BlockSpec((k, 1), lambda i: (0, 0))],
        out_specs=(pl.BlockSpec((k, te), lambda i: (0, i)),
                   pl.BlockSpec((k, te), lambda i: (0, i))),
        compiler_params=pltpu.CompilerParams(dimension_semantics=("parallel",)),
        cost_estimate=cost,
    )(d2, freq_col)
    return bessel_t[:, :E].T, radial_table


# ---------------------------------------------------------------------------
# Kernel 2: per-TRIPLET spherical basis, (n*k, T) lane-major (transpose-free).
# ---------------------------------------------------------------------------
def _sbf_kernel(rbf_ref, ang_ref, out_ref, *, num_spherical):
    # rbf_ref: (k, tile) per-triplet gathered radial factor (already enveloped)
    # ang_ref: (1, tile)
    # out_ref: (n, k, tile); out[i, j, t] = rbf[j, t] * cbf_i(t)
    rbf = rbf_ref[...]
    ang = ang_ref[...]
    out_ref[0] = rbf.astype(out_ref.dtype)
    for i in range(1, num_spherical):
        # NOTE(v7x): these (n-1) sins could be produced with the sin/cos
        # angle-addition recurrence (2 transcendentals total) once the 1e-5
        # tolerance is re-validated; direct sins keep exactness vs. reference.
        out_ref[i] = (rbf * jnp.sin(float(i) * ang)).astype(out_ref.dtype)


def spherical_basis_nk_major(radial_table, angle, idx_kj, *, num_spherical,
                             num_radial, tile=None, out_dtype=jnp.float32):
    """SphericalBasisLayer in (n*k, T) lane-major layout (no transpose pass).

    Consumers should contract over the leading n*k axis directly (dot_general),
    or use spherical_basis_lin_sbf1 below which fuses that contraction.
    """
    T = angle.shape[0]
    n, k = num_spherical, num_radial
    tile = _choose_tile(T, tile)
    Tp = pl.cdiv(T, tile) * tile
    pad = Tp - T

    # Glue: lane-dense gather of the per-edge table per triplet (k * 4 B/triplet).
    rbf_kj = radial_table[:, idx_kj]                       # (k, T)
    rbf2 = jnp.pad(rbf_kj, ((0, 0), (0, pad)))
    ang2 = jnp.pad(angle.astype(jnp.float32), (0, pad)).reshape(1, Tp)

    cost = pl.CostEstimate(
        flops=int(Tp * (n * k + 20 * (n - 1))),
        transcendentals=int(Tp * (n - 1)),
        bytes_accessed=int(Tp * 4 * (n * k + k + 1)),
    )
    out3 = pl.pallas_call(
        functools.partial(_sbf_kernel, num_spherical=n),
        out_shape=jax.ShapeDtypeStruct((n, k, Tp), out_dtype),
        grid=(Tp // tile,),
        in_specs=[pl.BlockSpec((k, tile), lambda i: (0, i)),
                  pl.BlockSpec((1, tile), lambda i: (0, i))],
        out_specs=pl.BlockSpec((n, k, tile), lambda i: (0, 0, i)),
        compiler_params=pltpu.CompilerParams(dimension_semantics=("parallel",)),
        cost_estimate=cost,
    )(rbf2, ang2)
    # Free reshape (leading-dim merge), lane-axis slice; NO transpose here.
    return out3.reshape(n * k, Tp)[:, :T]


# ---------------------------------------------------------------------------
# Kernel 3: spherical basis with fused lin_sbf1 (Linear(n*k -> B, bias-free)).
# ---------------------------------------------------------------------------
def _sbf_lin_kernel(rbf_ref, ang_ref, w_ref, out_ref, *, num_spherical):
    # rbf_ref: (kp, tile)  per-triplet radial factor, k zero-padded to kp
    # ang_ref: (1, tile)
    # w_ref  : (n, B, kp)  lin_sbf1 weight, per-order slabs, zero-padded on kp
    # out_ref: (B, tile)   == (sbf @ W.T) laid out lane-major
    rbf = rbf_ref[...]
    ang = ang_ref[...]
    acc = jnp.dot(w_ref[0], rbf, preferred_element_type=jnp.float32)   # cbf_0 = 1
    for i in range(1, num_spherical):
        acc += jnp.sin(float(i) * ang) * jnp.dot(
            w_ref[i], rbf, preferred_element_type=jnp.float32)
    out_ref[...] = acc.astype(out_ref.dtype)


def spherical_basis_lin_sbf1(radial_table, angle, idx_kj, w_sbf1, *,
                             num_spherical, num_radial, tile=None,
                             out_dtype=jnp.float32):
    """Fused SphericalBasisLayer -> lin_sbf1: returns (T, basis_emb_size)."""
    T = angle.shape[0]
    n, k = num_spherical, num_radial
    B = w_sbf1.shape[0]
    kp = -(-k // 8) * 8                                   # pad contraction dim
    tile = _choose_tile(T, tile)
    Tp = pl.cdiv(T, tile) * tile

    rbf_kj = radial_table[:, idx_kj]                      # (k, T) gather glue
    rbf2 = jnp.pad(rbf_kj, ((0, kp - k), (0, Tp - T)))
    ang2 = jnp.pad(angle.astype(jnp.float32), (0, Tp - T)).reshape(1, Tp)
    # W[b, i*k+j] -> (n, B, kp) per-order slabs (pure layout, done once).
    w3 = w_sbf1.astype(jnp.float32).reshape(B, n, k).transpose(1, 0, 2)
    w3 = jnp.pad(w3, ((0, 0), (0, 0), (0, kp - k)))

    cost = pl.CostEstimate(
        flops=int(Tp * (2 * n * B * kp + n * B + 20 * (n - 1))),
        transcendentals=int(Tp * (n - 1)),
        bytes_accessed=int(Tp * 4 * (B + kp + 1)) + int(w3.size * 4),
    )
    out = pl.pallas_call(
        functools.partial(_sbf_lin_kernel, num_spherical=n),
        out_shape=jax.ShapeDtypeStruct((B, Tp), out_dtype),
        grid=(Tp // tile,),
        in_specs=[pl.BlockSpec((kp, tile), lambda i: (0, i)),
                  pl.BlockSpec((1, tile), lambda i: (0, i)),
                  pl.BlockSpec((n, B, kp), lambda i: (0, 0, 0))],
        out_specs=pl.BlockSpec((B, tile), lambda i: (0, i)),
        compiler_params=pltpu.CompilerParams(dimension_semantics=("parallel",)),
        cost_estimate=cost,
    )(rbf2, ang2, w3)
    # (B, T) -> (T, B): only ~4*B bytes/triplet, vs 168 B for the unfused layer.
    return out[:, :T].T


# ---------------------------------------------------------------------------
# Drop-in PyTorch-layout wrapper (kept for API parity with the module).
# ---------------------------------------------------------------------------
def spherical_basis_layer(dist, angle, idx_kj, *, num_spherical, num_radial,
                          cutoff=5.0, envelope_exponent=5, tile=None,
                          out_dtype=jnp.float32):
    """SphericalBasisLayer.forward -> (T, num_spherical*num_radial).

    Prefer spherical_basis_nk_major (transpose-free) or the fused
    spherical_basis_lin_sbf1 inside the full model; the final transpose here
    is layout plumbing for PyTorch-layout compatibility only.
    """
    freq = jnp.arange(1, num_radial + 1, dtype=jnp.float32) * PI
    _, radial_table = edge_radial_tables(dist, freq, num_radial=num_radial,
                                         cutoff=cutoff,
                                         envelope_exponent=envelope_exponent)
    sbf_nk = spherical_basis_nk_major(radial_table, angle, idx_kj,
                                      num_spherical=num_spherical,
                                      num_radial=num_radial, tile=tile,
                                      out_dtype=out_dtype)
    return sbf_nk.T


# ---------------------------------------------------------------------------
# Pure-JAX references (mirror the PyTorch module exactly).
# ---------------------------------------------------------------------------
def _reference_sbf(dist, angle, idx_kj, num_spherical, num_radial, cutoff,
                   envelope_exponent):
    p = envelope_exponent + 1
    a = -(p + 1) * (p + 2) / 2.0
    b = p * (p + 2)
    c = -p * (p + 1) / 2.0
    d = dist / cutoff
    j = jnp.arange(1, num_radial + 1, dtype=jnp.float32)
    arg = j * jnp.pi * d[:, None]
    rbf = jnp.sin(arg) / arg                                     # (E, k)
    rbf = jnp.tile(rbf, (1, num_spherical))                      # (E, n*k)
    env = (1.0 / d + a * d ** (p - 1) + b * d ** p + c * d ** (p + 1)) * (d < 1.0)
    rbf = env[:, None] * rbf
    l = jnp.arange(num_spherical, dtype=jnp.float32)
    cbf = jnp.where(l[None, :] == 0, 1.0, jnp.sin(l[None, :] * angle[:, None]))
    out = (rbf[idx_kj].reshape(-1, num_spherical, num_radial) *
           cbf[:, :, None]).reshape(-1, num_spherical * num_radial)
    return out


def _reference_bessel(dist, freq, cutoff, envelope_exponent):
    p = envelope_exponent + 1
    a = -(p + 1) * (p + 2) / 2.0
    b = p * (p + 2)
    c = -p * (p + 1) / 2.0
    d = dist / cutoff
    env = (1.0 / d + a * d ** (p - 1) + b * d ** p + c * d ** (p + 1)) * (d < 1.0)
    return env[:, None] * jnp.sin(freq[None, :] * d[:, None])


if __name__ == "__main__":
    num_spherical = 7
    num_radial = 6
    cutoff = 5.0
    envelope_exponent = 5
    basis_emb_size = 8

    E = 48    # edges
    T = 300   # triplets (auto tile -> 256, Tp=512, 2 "parallel" grid steps)

    key = jax.random.PRNGKey(0)
    k1, k2, k3, k4 = jax.random.split(key, 4)
    dist = jax.random.uniform(k1, (E,), jnp.float32, minval=0.5, maxval=4.5)
    angle = jax.random.uniform(k2, (T,), jnp.float32, minval=0.0, maxval=PI)
    idx_kj = jax.random.randint(k3, (T,), 0, E, dtype=jnp.int32)
    w_sbf1 = 0.1 * jax.random.normal(
        k4, (basis_emb_size, num_spherical * num_radial), jnp.float32)

    # BesselBasisLayer frequency parameter at its reset_parameters() value.
    freq = jnp.arange(1, num_radial + 1, dtype=jnp.float32) * PI

    # 1) Per-edge kernel: BesselBasisLayer output + SBF radial table.
    bessel, radial_table = edge_radial_tables(
        dist, freq, num_radial=num_radial, cutoff=cutoff,
        envelope_exponent=envelope_exponent)

    # 2) Per-triplet kernel in the preferred (n*k, T) lane-major layout.
    sbf_nk = spherical_basis_nk_major(
        radial_table, angle, idx_kj,
        num_spherical=num_spherical, num_radial=num_radial)

    # 3) Drop-in (T, n*k) layout (PyTorch-compatible; transpose is plumbing).
    sbf = spherical_basis_layer(
        dist, angle, idx_kj, num_spherical=num_spherical,
        num_radial=num_radial, cutoff=cutoff,
        envelope_exponent=envelope_exponent)

    # 4) Fused SphericalBasisLayer -> lin_sbf1 (InteractionPPBlock epilogue).
    sbf_emb = spherical_basis_lin_sbf1(
        radial_table, angle, idx_kj, w_sbf1,
        num_spherical=num_spherical, num_radial=num_radial)

    bessel, sbf_nk, sbf, sbf_emb = jax.block_until_ready(
        (bessel, sbf_nk, sbf, sbf_emb))

    # ---- validation against pure-JAX references -----------------------------
    ref_bessel = _reference_bessel(dist, freq, cutoff, envelope_exponent)
    ref_sbf = _reference_sbf(dist, angle, idx_kj, num_spherical, num_radial,
                             cutoff, envelope_exponent)
    ref_emb = jnp.dot(ref_sbf, w_sbf1.T,
                      precision=jax.lax.Precision.HIGHEST)

    assert bessel.shape == (E, num_radial)
    assert sbf_nk.shape == (num_spherical * num_radial, T)
    assert sbf.shape == (T, num_spherical * num_radial)
    assert sbf_emb.shape == (T, basis_emb_size)

    assert jnp.allclose(bessel, ref_bessel, rtol=1e-5, atol=1e-5), "bessel mismatch"
    assert jnp.allclose(sbf_nk.T, ref_sbf, rtol=1e-5, atol=1e-5), "sbf(nk,T) mismatch"
    assert jnp.allclose(sbf, ref_sbf, rtol=1e-5, atol=1e-5), "sbf mismatch"
    # Looser tolerance: the fused epilogue runs on the MXU, whose default f32
    # pass decomposition / accumulation order differs from the XLA reference.
    assert jnp.allclose(sbf_emb, ref_emb, rtol=1e-2, atol=1e-2), "fused mismatch"

    print("KERNEL_OK")
</pallas_src>

<mosaic_0001>
module attributes {stable_mosaic.version = 11 : i64} {
  func.func @_edge_radial_kernel(%arg0: i32, %arg1: memref<1x128xf32, #tpu.memory_space<vmem>>, %arg2: memref<6x1xf32, #tpu.memory_space<vmem>>, %arg3: memref<6x128xf32, #tpu.memory_space<vmem>>, %arg4: memref<6x128xf32, #tpu.memory_space<vmem>>) attributes {dimension_semantics = [#tpu.dimension_semantics<parallel>], iteration_bounds = array<i64: 1>, scalar_prefetch = 0 : i64, scratch_operands = 0 : i64, tpu.core_type = #tpu.core_type<tc>, window_params = [{transform_indices = @transform_0, window_bounds = array<i64: 1, 128>}, {pipeline_mode = #tpu.pipeline_mode<synchronous>, transform_indices = @transform_1, window_bounds = array<i64: 6, 1>}, {transform_indices = @transform_2, window_bounds = array<i64: 6, 128>}, {transform_indices = @transform_3, window_bounds = array<i64: 6, 128>}]} {
    %c0 = arith.constant 0 : index
    %c0_0 = arith.constant 0 : index
    %0 = vector.load %arg1[%c0, %c0_0] : memref<1x128xf32, #tpu.memory_space<vmem>>, vector<1x128xf32>
    %cst = arith.constant 2.000000e-01 : f32
    %1 = vector.broadcast %cst : f32 to vector<1x128xf32>
    %2 = arith.mulf %0, %1 : vector<1x128xf32>
    %cst_1 = arith.constant 1.000000e+00 : f32
    %3 = vector.broadcast %cst_1 : f32 to vector<1x128xf32>
    %4 = arith.divf %3, %2 : vector<1x128xf32>
    %5 = arith.mulf %2, %2 : vector<1x128xf32>
    %6 = arith.mulf %5, %5 : vector<1x128xf32>
    %7 = arith.mulf %2, %6 : vector<1x128xf32>
    %8 = arith.mulf %7, %2 : vector<1x128xf32>
    %9 = arith.mulf %8, %2 : vector<1x128xf32>
    %cst_2 = arith.constant -2.800000e+01 : f32
    %10 = vector.broadcast %cst_2 : f32 to vector<1x128xf32>
    %11 = arith.mulf %10, %7 : vector<1x128xf32>
    %12 = arith.addf %4, %11 : vector<1x128xf32>
    %cst_3 = arith.constant 4.800000e+01 : f32
    %13 = vector.broadcast %cst_3 : f32 to vector<1x128xf32>
    %14 = arith.mulf %13, %8 : vector<1x128xf32>
    %15 = arith.addf %12, %14 : vector<1x128xf32>
    %cst_4 = arith.constant -2.100000e+01 : f32
    %16 = vector.broadcast %cst_4 : f32 to vector<1x128xf32>
    %17 = arith.mulf %16, %9 : vector<1x128xf32>
    %18 = arith.addf %15, %17 : vector<1x128xf32>
    %cst_5 = arith.constant 1.000000e+00 : f32
    %19 = vector.broadcast %cst_5 : f32 to vector<1x128xf32>
    %20 = arith.cmpf olt, %2, %19 : vector<1x128xf32>
    %21 = arith.extui %20 : vector<1x128xi1> to vector<1x128xi32>
    %22 = arith.sitofp %21 : vector<1x128xi32> to vector<1x128xf32>
    %23 = arith.mulf %18, %22 : vector<1x128xf32>
    %c0_6 = arith.constant 0 : index
    %c0_7 = arith.constant 0 : index
    %24 = vector.load %arg2[%c0_6, %c0_7] : memref<6x1xf32, #tpu.memory_space<vmem>>, vector<6x1xf32>
    %25 = vector.broadcast %24 : vector<6x1xf32> to vector<6x128xf32>
    %26 = vector.broadcast %2 : vector<1x128xf32> to vector<6x128xf32>
    %27 = arith.mulf %25, %26 : vector<6x128xf32>
    %28 = math.sin %27 : vector<6x128xf32>
    %29 = vector.broadcast %23 : vector<1x128xf32> to vector<6x128xf32>
    %30 = arith.mulf %29, %28 : vector<6x128xf32>
    %c0_8 = arith.constant 0 : index
    %c0_9 = arith.constant 0 : index
    %31 = vector.load %arg3[%c0_8, %c0_9] : memref<6x128xf32, #tpu.memory_space<vmem>>, vector<6x128xf32>
    tpu.vector_store %arg3[%c0_8, %c0_9], %30 {strides = array<i32>} : memref<6x128xf32, #tpu.memory_space<vmem>>, vector<6x128xf32>,
    %32 = tpu.iota {dimensions = array<i32: 0>} : vector<6x1xi32>
    %33 = arith.sitofp %32 : vector<6x1xi32> to vector<6x1xf32>
    %cst_10 = arith.constant 1.000000e+00 : f32
    %34 = vector.broadcast %cst_10 : f32 to vector<6x1xf32>
    %35 = arith.addf %33, %34 : vector<6x1xf32>
    %cst_11 = arith.constant 3.14159274 : f32
    %36 = vector.broadcast %cst_11 : f32 to vector<6x1xf32>
    %37 = arith.mulf %35, %36 : vector<6x1xf32>
    %38 = vector.broadcast %37 : vector<6x1xf32> to vector<6x128xf32>
    %39 = vector.broadcast %2 : vector<1x128xf32> to vector<6x128xf32>
    %40 = arith.mulf %38, %39 : vector<6x128xf32>
    %41 = math.sin %40 : vector<6x128xf32>
    %cst_12 = arith.constant 1.000000e+00 : f32
    %42 = vector.broadcast %cst_12 : f32 to vector<6x1xf32>
    %43 = arith.divf %42, %37 : vector<6x1xf32>
    %44 = arith.mulf %4, %23 : vector<1x128xf32>
    %45 = vector.broadcast %43 : vector<6x1xf32> to vector<6x128xf32>
    %46 = vector.broadcast %44 : vector<1x128xf32> to vector<6x128xf32>
    %47 = arith.mulf %45, %46 : vector<6x128xf32>
    %48 = arith.mulf %41, %47 : vector<6x128xf32>
    %c0_13 = arith.constant 0 : index
    %c0_14 = arith.constant 0 : index
    %49 = vector.load %arg4[%c0_13, %c0_14] : memref<6x128xf32, #tpu.memory_space<vmem>>, vector<6x128xf32>
    tpu.vector_store %arg4[%c0_13, %c0_14], %48 {strides = array<i32>} : memref<6x128xf32, #tpu.memory_space<vmem>>, vector<6x128xf32>,
    return
  }
  func.func @transform_0(%arg0: i32) -> (i32, i32) {
    %c0_i32 = arith.constant 0 : i32
    %c0_i32_0 = arith.constant 0 : i32
    return %c0_i32, %arg0 : i32, i32
  }
  func.func @transform_1(%arg0: i32) -> (i32, i32) {
    %c0_i32 = arith.constant 0 : i32
    %c0_i32_0 = arith.constant 0 : i32
    %c0_i32_1 = arith.constant 0 : i32
    return %c0_i32, %c0_i32_0 : i32, i32
  }
  func.func @transform_2(%arg0: i32) -> (i32, i32) {
    %c0_i32 = arith.constant 0 : i32
    %c0_i32_0 = arith.constant 0 : i32
    return %c0_i32, %arg0 : i32, i32
  }
  func.func @transform_3(%arg0: i32) -> (i32, i32) {
    %c0_i32 = arith.constant 0 : i32
    %c0_i32_0 = arith.constant 0 : i32
    return %c0_i32, %arg0 : i32, i32
  }
}

</mosaic_0001>

<bundles_post_ra>
// kernel: tpu_custom_call.1
= control target key start
LH: loop header
LB: loop body
LE: loop exit
PB: predicated region body
PF: predicated region fallthrough
CT: control target
= control target key end

     0   :  { %9 = vsyncpa [#allocation3], 0  ;;  %v41_v1 = vlaneseq  ;;  %v397_v2 = vmov 0   ;;  %s559_s0 = inlined_call_operand.vmem [shape: f32[1,128], index: 0, kind: input, shape index: {}]   ;;  %s560_s1 = inlined_call_operand.vmem [shape: f32[6,1], index: 1, kind: input, shape index: {}]   ;;  %s561_s2 = inlined_call_operand.hbm [shape: f32[6,128], index: 2, kind: output, shape index: {0}]   ;;  %s562_s3 = inlined_call_operand.hbm [shape: f32[6,128], index: 3, kind: output, shape index: {1}]  }
   0x1   :  { %v34_v0 = vld [vmem:[%s560_s1] sm:$0x3f]  ;;  %336 = vset.pattern.permute.xlu0 %v397_v2 }
   0x2   :  { %37 = vperm.xlu0 %336, %v34_v0   ;;  %v42_v3 = vshrl.u32 %v41_v1, 7  ;;  %v15_v4 = vld [vmem:[%s559_s0] sm:$0x1] }
   0x3   :  { %10 = vsyncpa [#allocation5], 0  ;;  %v435_v7 = vmul.f32 0.2, %v15_v4  ;;  %v398_v22 = vmov 683565275  }
   0x4   :  { %v433_v5 = vsub.s32 0, %v42_v3  ;;  %v161_v6 = vcvt.s32.f32 %v42_v3  ;;  %v399_v24 = vmov 2475754826   ;;  %v400_v27 = vmov 2131351028   ;;  %s405_s0 = smov [#allocation4]  }
   0x5   :  { %v401_v29 = vmov 2102212464   ;;  %v402_v31 = vmov 920167782   ;;  %v403_v33 = vmov 1326507024   ;;  %337 = vrcp.f32 %v435_v7 }
   0x6   :  { %v162_v8 = vadd.f32 1.0, %v161_v6  ;;  %v439_v9 = vrot.slane %v435_v7, %v433_v5  ;;  %vm30_vm7 = vcmp.lt.f32.partialorder %v435_v7, 1.0  ;;  %s297_s1 = sshll.u32 %s405_s0, 4  ;;  %s298_s1 = int_to_ptr.vmem [resolvable:$true] %s297_s1 }
   0x7   :  { %s349_s16 = scalar_lea.vmem %s298_s1, 128  ;;  %p354_p1 = scmp.lt.s32.totalorder %s298_s1, %s298_s1 }
   0x8   :  { %v441_v10 = vmul.f32 3.1415927, %v162_v8  ;;  %p350_p0 = scmp.ne.s32.totalorder %s298_s1, %s349_s16  ;;  %p355_p2 = scmp.lt.s32.totalorder %s349_s16, %s349_s16 }
   0xa   :  { %v445_v11 = vmul.f32 %v441_v10, %v439_v9  ;;  %339 = vrcp.f32 %v441_v10  ;;  %p356_p3 = por %p355_p2, %p354_p1 }
   0xc   :  { %v168_v12 = vand.u32 2139095040, %v445_v11  ;;  %v165_v16 = vand.u32 2147483647, %v445_v11  ;;  %vm167_vm9 = vcmp.lt.s32.totalorder %v445_v11, 0  ;;  %vm257_vm13 = vweird.f32 %v445_v11  ;;  %p357_p4 = pnand %p356_p3, %p350_p0 }
   0xe   :  { %v169_v13 = vshrl.u32 %v168_v12, 23  ;;  %v172_v19 = vand.u32 8388607, %v165_v16  ;;  %vm483_vm8 = vcmp.le.f32.partialorder %v165_v16, 0.7853982 }
  0x10   :  { %v314_v14 = vadd.s32 4294967169, %v169_v13  ;;  %v173_v26 = vor.u32 8388608, %v172_v19 }
  0x12   :  { %v175_v15 = vadd.s32 1, %v314_v14  ;;  %v213_v45 = vshll.u32 %v173_v26, 8 }
  0x14   :  { %vm176_vm0 = vcmp.gt.s32.totalorder %v175_v15, 0 }
  0x15   :  { %v177_v17 = vsel %vm176_vm0, %v175_v15, 0 }
  0x16   :  { %v179_v18 = vand.u32 31, %v177_v17  ;;  %v178_v20 = vshrl.u32 %v177_v17, 5 }
  0x18   :  { %v180_v21 = vsub.s32 32, %v179_v18  ;;  %v182_v23 = vshll.u32 %v398_v22, %v179_v18  ;;  %v185_v25 = vshll.u32 %v399_v24, %v179_v18  ;;  %v188_v28 = vshll.u32 %v400_v27, %v179_v18 }
  0x19   :  { %v191_v30 = vshll.u32 %v401_v29, %v179_v18  ;;  %v194_v32 = vshll.u32 %v402_v31, %v179_v18  ;;  %vm197_vm1 = vcmp.lt.s32.totalorder %v178_v20, 1  ;;  %vm199_vm2 = vcmp.lt.s32.totalorder %v178_v20, 3 }
  0x1a   :  { %v195_v34 = vshrl.u32 %v403_v33, %v180_v21  ;;  %v183_v35 = vshrl.u32 %v399_v24, %v180_v21  ;;  %v186_v36 = vshrl.u32 %v400_v27, %v180_v21  ;;  %v189_v37 = vshrl.u32 %v401_v29, %v180_v21 }
  0x1b   :  { %v192_v38 = vshrl.u32 %v402_v31, %v180_v21  ;;  %vm200_vm3 = vcmp.lt.s32.totalorder %v178_v20, 4  ;;  %v181_v43 = vshrl.u32 %v398_v22, %v180_v21  ;;  %vm198_vm4 = vcmp.lt.s32.totalorder %v178_v20, 2 }
  0x1c   :  { %v184_v39 = vor.u32 %v183_v35, %v182_v23  ;;  %v187_v40 = vor.u32 %v186_v36, %v185_v25  ;;  %v190_v41 = vor.u32 %v189_v37, %v188_v28  ;;  %v196_v42 = vor.u32 %v195_v34, %v194_v32 }
  0x1d   :  { %v193_v44 = vor.u32 %v192_v38, %v191_v30  ;;  %v19_v25 = vmul.f32 %v435_v7, %v435_v7 }
  0x1e   :  { %v202_v46 = vsel %vm200_vm3, %v190_v41, 2102212464  ;;  %v205_v47 = vsel %vm197_vm1, %v184_v39, %v187_v40  ;;  %v209_v48 = vsel %vm197_vm1, %v187_v40, %v190_v41  ;;  %v210_v49 = vsel %vm200_vm3, %v196_v42, 1326507024 }
  0x1f   :  { %v201_v50 = vsel %vm197_vm1, %v181_v43, %v184_v39  ;;  %v203_v51 = vsel %vm199_vm2, %v187_v40, %v202_v46  ;;  %v206_v52 = vsel %vm200_vm3, %v193_v44, 920167782  ;;  %v211_v53 = vsel %vm199_vm2, %v193_v44, %v210_v49  ;;  %v338_v40 = vpop.eup %337 }
  0x20   :  { %v207_v54 = vsel %vm199_vm2, %v190_v41, %v206_v52  ;;  %v212_v55 = vsel %vm198_vm4, %v209_v48, %v211_v53  ;;  %v204_v59 = vsel %vm198_vm4, %v201_v50, %v203_v51  ;;  %v20_v30 = vmul.f32 %v19_v25, %v19_v25  ;;  %v340_v10 = vpop.eup %339 }
  0x21   :  { %v208_v56 = vsel %vm198_vm4, %v205_v47, %v207_v54  ;;  %v465_v57 = vmul.u32.u64.low %v213_v45, %v212_v55  ;;  %v466_v58 = vmul.u32.u64.high %v213_v45, %v212_v55, %v465_v57  ;;  %v220_v62 = vmul.u32 %v213_v45, %v204_v59 }
  0x22   :  { %v468_v60 = vmul.u32.u64.low %v213_v45, %v208_v56  ;;  %v469_v61 = vmul.u32.u64.high %v213_v45, %v208_v56, %v468_v60  ;;  %v21_v35 = vmul.f32 %v20_v30, %v435_v7  ;;  %v404_v50 = vmov 0.0  }
  0x23   :  { %v309_v51 = vsel %vm30_vm7, 1.0, %v404_v50 }
  0x24   :  { %vm222_vm5 = vc.u32 %v466_v58, %v468_v60  ;;  %v223_v63 = vadd.s32 1, %v469_v61  ;;  %v221_v15 = vadd.s32 %v468_v60, %v466_v58  ;;  %v22_v37 = vmul.f32 %v21_v35, %v435_v7 }
  0x25   :  { %v24_v38 = vmul.f32 -28.0, %v21_v35 }
  0x26   :  { %v224_v0 = vsel %vm222_vm5, %v223_v63, %v469_v61  ;;  %v23_v42 = vmul.f32 %v22_v37, %v435_v7  ;;  %v26_v44 = vmul.f32 48.0, %v22_v37 }
  0x27   :  { %v225_v1 = vadd.s32 %v224_v0, %v220_v62  ;;  %v25_v43 = vadd.f32 %v338_v40, %v24_v38 }
  0x28   :  { %v28_v47 = vmul.f32 -21.0, %v23_v42 }
  0x29   :  { %v226_v2 = vadd.s32 536870912, %v225_v1  ;;  %v27_v46 = vadd.f32 %v26_v44, %v25_v43 }
  0x2b   :  { %v227_v3 = vshrl.u32 %v226_v2, 30  ;;  %v29_v52 = vadd.f32 %v28_v47, %v27_v46 }
  0x2d   :  { %v228_v4 = vshll.u32 %v227_v3, 30  ;;  %v251_v49 = vsub.s32 4, %v227_v3  ;;  %v495_v54 = vmul.f32 %v309_v51, %v29_v52 }
  0x2f   :  { %v229_v6 = vsub.s32 %v225_v1, %v228_v4  ;;  %v252_v53 = vsel %vm167_vm9, %v251_v49, %v227_v3  ;;  %v271_v56 = vmul.f32 %v338_v40, %v495_v54 }
  0x30   :  { %v254_v7 = vsel %vm483_vm8, 0, %v252_v53 }
  0x31   :  { %v231_v8 = vsub.s32 0, %v229_v6  ;;  %v258_v55 = vadd.s32 3, %v254_v7  ;;  %v276_v58 = vrot.slane %v271_v56, %v433_v5 }
  0x33   :  { %v315_v12 = vmin.u32 %v231_v8, %v229_v6  ;;  %v259_v57 = vand.u32 3, %v258_v55  ;;  %v278_v0 = vmul.f32 %v340_v10, %v276_v58 }
  0x35   :  { %v233_v13 = vclz %v315_v12  ;;  %vm264_vm10 = vcmp.eq.s32.totalorder %v259_v57, 2  ;;  %vm261_vm11 = vcmp.eq.s32.totalorder %v259_v57, 0  ;;  %vm260_vm12 = vcmp.lt.s32.totalorder %v259_v57, 2 }
  0x37   :  { %v316_v14 = vadd.s32 4294967294, %v233_v13 }
  0x39   :  { %vm317_vm6 = vcmp.lt.s32.totalorder %v316_v14, 0 }
  0x3a   :  { %v236_v17 = vsel %vm317_vm6, 0, %v316_v14 }
  0x3b   :  { %v237_v18 = vsub.s32 32, %v236_v17  ;;  %v238_v19 = vshll.u32 %v229_v6, %v236_v17  ;;  %v241_v20 = vsub.s32 4294967266, %v236_v17 }
  0x3d   :  { %v239_v21 = vshrl.u32 %v221_v15, %v237_v18  ;;  %v242_v23 = vadd.s32 127, %v241_v20 }
  0x3f   :  { %v240_v26 = vor.u32 %v239_v21, %v238_v19  ;;  %v243_v28 = vshll.u32 %v242_v23, 23 }
  0x41   :  { %v244_v32 = vor.u32 4788187, %v243_v28  ;;  %v247_v34 = vcvt.s32.f32 %v240_v26 }
  0x43   :  { %v245_v36 = vand.u32 2147483647, %v244_v32 }
  0x45   :  { %v248_v39 = vmul.f32 %v247_v34, %v245_v36 }
  0x47   :  { %v249_v45 = vxor.u32 2147483648, %v248_v39 }
  0x49   :  { %v250_v48 = vsel %vm167_vm9, %v249_v45, %v248_v39 }
  0x4a   :  { %v253_v16 = vsel %vm483_vm8, %v445_v11, %v250_v48 }
  0x4b   :  { %341 = vcosq.f32 %v253_v16 }
  0x4c   :  { %343 = vsinq.f32 %v253_v16 }
  0x55   :  { %v342_v59 = vpop.eup %341 }
  0x56   :  { %v344_v60 = vpop.eup %343  ;;  %v265_v61 = vxor.u32 2147483648, %v342_v59 }
  0x57   :  { %v262_v62 = vxor.u32 2147483648, %v344_v60 }
  0x58   :  { %v266_v63 = vsel %vm264_vm10, %v265_v61, %v344_v60 }
  0x59   :  { %v263_v1 = vsel %vm261_vm11, %v342_v59, %v262_v62 }
  0x5a   :  { %v267_v2 = vsel %vm260_vm12, %v263_v1, %v266_v63 }
  0x5b   :  { %v268_v3 = vsel %vm257_vm13, nan, %v267_v2 }
  0x5c   :  { %v279_v4 = vmul.f32 %v278_v0, %v268_v3 }
  0x5e   :  { %280 = vst [vmem:[#allocation4] sm:$0x3f] %v279_v4 }
  0x5f   :  { %360 = shalt.err (!%p357_p4)
}
  0x60   :  { %s361_s19 = scalar_lea.hbm %s562_s3, 128 }
  0x61   :  { %p362_p5 = scmp.ne.s32.totalorder %s562_s3, %s361_s19  ;;  %p365_p6 = scmp.lt.u32.totalorder %s361_s19, %s562_s3 }
  0x63   :  { %p367_p7 = pnand %p365_p6, %p362_p5 }
  0x65   :  { %370 = shalt.err (!%p367_p7)
}
  0x66   :  { %300 = dma.vmem_to_hbm [thread:$0]  %s298_s1, 128, %s562_s3, [#allocation5]  }
  0x67   :  { %s406_s3 = smov [#allocation2]  }
  0x68   :  { %s287_s26 = sshll.u32 %s406_s3, 4  ;;  %s288_s26 = int_to_ptr.vmem [resolvable:$true] %s287_s26 }
  0x69   :  { %s371_s27 = scalar_lea.vmem %s288_s26, 128  ;;  %p376_p9 = scmp.lt.s32.totalorder %s288_s26, %s288_s26 }
  0x6a   :  { %p372_p8 = scmp.ne.s32.totalorder %s288_s26, %s371_s27  ;;  %p377_p10 = scmp.lt.s32.totalorder %s371_s27, %s371_s27 }
  0x6c   :  { %p378_p11 = por %p377_p10, %p376_p9 }
  0x6e   :  { %p379_p12 = pnand %p378_p11, %p372_p8 }
  0x81   :  { %v38_v11 = vpop.permute.xlu0 %37 }
  0x82   :  { %v513_v6 = vmul.f32 %v439_v9, %v38_v11 }
  0x84   :  { %v50_v8 = vand.u32 2139095040, %v513_v6  ;;  %v47_v15 = vand.u32 2147483647, %v513_v6  ;;  %vm49_vm5 = vcmp.lt.s32.totalorder %v513_v6, 0  ;;  %vm139_vm10 = vweird.f32 %v513_v6 }
  0x86   :  { %v51_v12 = vshrl.u32 %v50_v8, 23  ;;  %v54_v19 = vand.u32 8388607, %v47_v15  ;;  %vm48_vm6 = vcmp.le.f32.partialorder %v47_v15, 0.7853982 }
  0x88   :  { %v310_v13 = vadd.s32 4294967169, %v51_v12  ;;  %v55_v37 = vor.u32 8388608, %v54_v19 }
  0x8a   :  { %v57_v14 = vadd.s32 1, %v310_v13 }
  0x8c   :  { %vm58_vm14 = vcmp.gt.s32.totalorder %v57_v14, 0 }
  0x8d   :  { %v59_v17 = vsel %vm58_vm14, %v57_v14, 0 }
  0x8e   :  { %v61_v18 = vand.u32 31, %v59_v17  ;;  %v60_v21 = vshrl.u32 %v59_v17, 5 }
  0x90   :  { %v62_v20 = vsub.s32 32, %v61_v18  ;;  %v64_v23 = vshll.u32 %v398_v22, %v61_v18  ;;  %v67_v9 = vshll.u32 %v399_v24, %v61_v18  ;;  %v70_v28 = vshll.u32 %v400_v27, %v61_v18 }
  0x91   :  { %v73_v32 = vshll.u32 %v401_v29, %v61_v18  ;;  %v76_v35 = vshll.u32 %v402_v31, %v61_v18  ;;  %vm79_vm15 = vcmp.lt.s32.totalorder %v60_v21, 1  ;;  %vm82_vm0 = vcmp.lt.s32.totalorder %v60_v21, 4 }
  0x92   :  { %v65_v25 = vshrl.u32 %v399_v24, %v62_v20  ;;  %v68_v26 = vshrl.u32 %v400_v27, %v62_v20  ;;  %v71_v30 = vshrl.u32 %v401_v29, %v62_v20  ;;  %v74_v34 = vshrl.u32 %v402_v31, %v62_v20 }
  0x93   :  { %v77_v36 = vshrl.u32 %v403_v33, %v62_v20  ;;  %v63_v44 = vshrl.u32 %v398_v22, %v62_v20  ;;  %vm81_vm1 = vcmp.lt.s32.totalorder %v60_v21, 3  ;;  %vm80_vm2 = vcmp.lt.s32.totalorder %v60_v21, 2 }
  0x94   :  { %v66_v38 = vor.u32 %v65_v25, %v64_v23  ;;  %v69_v39 = vor.u32 %v68_v26, %v67_v9  ;;  %v72_v40 = vor.u32 %v71_v30, %v70_v28  ;;  %v75_v41 = vor.u32 %v74_v34, %v73_v32 }
  0x95   :  { %v78_v24 = vor.u32 %v77_v36, %v76_v35  ;;  %v95_v33 = vshll.u32 %v55_v37, 8 }
  0x96   :  { %v84_v42 = vsel %vm82_vm0, %v72_v40, 2102212464  ;;  %v87_v27 = vsel %vm79_vm15, %v66_v38, %v69_v39  ;;  %v91_v43 = vsel %vm79_vm15, %v69_v39, %v72_v40  ;;  %v88_v29 = vsel %vm82_vm0, %v75_v41, 920167782 }
  0x97   :  { %v92_v45 = vsel %vm82_vm0, %v78_v24, 1326507024  ;;  %v89_v31 = vsel %vm81_vm1, %v72_v40, %v88_v29  ;;  %v83_v47 = vsel %vm79_vm15, %v63_v44, %v66_v38  ;;  %v85_v48 = vsel %vm81_vm1, %v69_v39, %v84_v42 }
  0x98   :  { %v93_v46 = vsel %vm81_vm1, %v75_v41, %v92_v45  ;;  %v90_v49 = vsel %vm80_vm2, %v87_v27, %v89_v31  ;;  %v86_v7 = vsel %vm80_vm2, %v83_v47, %v85_v48  ;;  %v155_v39 = vrot.slane %v495_v54, %v433_v5 }
  0x99   :  { %v94_v50 = vsel %vm80_vm2, %v91_v43, %v93_v46  ;;  %v533_v52 = vmul.u32.u64.low %v95_v33, %v90_v49  ;;  %v534_v53 = vmul.u32.u64.high %v95_v33, %v90_v49, %v533_v52  ;;  %v102_v55 = vmul.u32 %v95_v33, %v86_v7 }
  0x9a   :  { %v530_v51 = vmul.u32.u64.low %v95_v33, %v94_v50  ;;  %v531_v16 = vmul.u32.u64.high %v95_v33, %v94_v50, %v530_v51 }
  0x9b   :  { %v105_v22 = vadd.s32 1, %v534_v53 }
  0x9c   :  { %vm104_vm3 = vc.u32 %v531_v16, %v533_v52  ;;  %v103_v2 = vadd.s32 %v533_v52, %v531_v16 }
  0x9d   :  { %v106_v56 = vsel %vm104_vm3, %v105_v22, %v534_v53 }
  0x9e   :  { %v107_v57 = vadd.s32 %v106_v56, %v102_v55 }
  0xa0   :  { %v108_v10 = vadd.s32 536870912, %v107_v57 }
  0xa2   :  { %v109_v58 = vshrl.u32 %v108_v10, 30 }
  0xa4   :  { %v110_v59 = vshll.u32 %v109_v58, 30  ;;  %v133_v21 = vsub.s32 4, %v109_v58 }
  0xa6   :  { %v111_v60 = vsub.s32 %v107_v57, %v110_v59  ;;  %v134_v25 = vsel %vm49_vm5, %v133_v21, %v109_v58 }
  0xa7   :  { %v136_v28 = vsel %vm48_vm6, 0, %v134_v25 }
  0xa8   :  { %v113_v61 = vsub.s32 0, %v111_v60  ;;  %v140_v30 = vadd.s32 3, %v136_v28 }
  0xaa   :  { %v311_v62 = vmin.u32 %v113_v61, %v111_v60  ;;  %v141_v32 = vand.u32 3, %v140_v30 }
  0xac   :  { %v115_v63 = vclz %v311_v62  ;;  %vm146_vm7 = vcmp.eq.s32.totalorder %v141_v32, 2  ;;  %vm143_vm8 = vcmp.eq.s32.totalorder %v141_v32, 0  ;;  %vm142_vm9 = vcmp.lt.s32.totalorder %v141_v32, 2 }
  0xae   :  { %v312_v0 = vadd.s32 4294967294, %v115_v63 }
  0xb0   :  { %vm313_vm4 = vcmp.lt.s32.totalorder %v312_v0, 0 }
  0xb1   :  { %v118_v1 = vsel %vm313_vm4, 0, %v312_v0 }
  0xb2   :  { %v119_v3 = vsub.s32 32, %v118_v1  ;;  %v123_v4 = vsub.s32 4294967266, %v118_v1  ;;  %v120_v11 = vshll.u32 %v111_v60, %v118_v1 }
  0xb4   :  { %v121_v8 = vshrl.u32 %v103_v2, %v119_v3  ;;  %v124_v12 = vadd.s32 127, %v123_v4 }
  0xb6   :  { %v122_v13 = vor.u32 %v121_v8, %v120_v11  ;;  %v125_v14 = vshll.u32 %v124_v12, 23 }
  0xb8   :  { %v126_v17 = vor.u32 4788187, %v125_v14  ;;  %v129_v19 = vcvt.s32.f32 %v122_v13 }
  0xba   :  { %v127_v18 = vand.u32 2147483647, %v126_v17 }
  0xbc   :  { %v130_v20 = vmul.f32 %v129_v19, %v127_v18 }
  0xbe   :  { %v131_v23 = vxor.u32 2147483648, %v130_v20 }
  0xc0   :  { %v132_v9 = vsel %vm49_vm5, %v131_v23, %v130_v20 }
  0xc1   :  { %v135_v26 = vsel %vm48_vm6, %v513_v6, %v132_v9 }
  0xc2   :  { %345 = vcosq.f32 %v135_v26 }
  0xc3   :  { %347 = vsinq.f32 %v135_v26 }
  0xcc   :  { %v346_v34 = vpop.eup %345 }
  0xcd   :  { %v348_v35 = vpop.eup %347  ;;  %v147_v36 = vxor.u32 2147483648, %v346_v34 }
  0xce   :  { %v144_v37 = vxor.u32 2147483648, %v348_v35 }
  0xcf   :  { %v148_v38 = vsel %vm146_vm7, %v147_v36, %v348_v35 }
  0xd0   :  { %v145_v15 = vsel %vm143_vm8, %v346_v34, %v144_v37 }
  0xd1   :  { %v149_v40 = vsel %vm142_vm9, %v145_v15, %v148_v38 }
  0xd2   :  { %v150_v41 = vsel %vm139_vm10, nan, %v149_v40 }
  0xd3   :  { %v157_v24 = vmul.f32 %v155_v39, %v150_v41 }
  0xd5   :  { %158 = vst [vmem:[#allocation2] sm:$0x3f] %v157_v24 }
  0xd6   :  { %382 = shalt.err (!%p379_p12)
}
  0xd7   :  { %s383_s30 = scalar_lea.hbm %s561_s2, 128 }
  0xd8   :  { %p384_p13 = scmp.ne.s32.totalorder %s561_s2, %s383_s30  ;;  %p387_p0 = scmp.lt.u32.totalorder %s383_s30, %s561_s2 }
  0xda   :  { %p389_p1 = pnand %p387_p0, %p384_p13 }
  0xdc   :  { %392 = shalt.err (!%p389_p1)
}
  0xdd   :  { %290 = dma.vmem_to_hbm [thread:$0]  %s288_s26, 128, %s561_s2, [#allocation3]  }
  0xde   :  { %393 = dma.done.wait [#allocation3], 128  }
  0xdf   :  { %394 = vsyncadd [#allocation3], 4294967168 }
  0xe0   :  { %395 = dma.done.wait [#allocation5], 128  }
  0xe1   :  { %396 = vsyncadd [#allocation5], 4294967168 }
  0xe2   :  { %307 = vsyncpa [#allocation3], 1 }
  0xe3   :  { %308 = vsyncpa [#allocation5], 1 }

</bundles_post_ra>
